<compile_context>
chip_gen: v7x
topology: tpu7x:2x2x1
jax: 0.10.0
libtpu: 0.0.40
codegen_flags: <defaults>
</compile_context>

<pallas_src>
import functools

import jax
import jax.numpy as jnp
from jax.experimental import pallas as pl
from jax.experimental.pallas import tpu as pltpu

_MiB = 1024 * 1024
_LANE = 128


def _round_up(v, m):
    return (v + m - 1) // m * m


def _vmem_array_bytes(shape, itemsize):
    """Conservative VMEM footprint of one array (lane dim -> 128, sublane -> pack)."""
    sub = 16 if itemsize == 2 else 8
    dims = list(shape)
    dims[-1] = _round_up(dims[-1], _LANE)
    if len(dims) >= 2:
        dims[-2] = _round_up(dims[-2], sub)
    total = itemsize
    for d in dims:
        total *= int(d)
    return total


def _default_tile_and_cap():
    """Per-generation channel-tile default and VMEM budget cap."""
    try:
        vmem_cap = int(pltpu.get_tpu_info().vmem_capacity_bytes)
    except Exception:
        vmem_cap = 64 * _MiB                     # assume smallest (v7x) if query fails
    if vmem_cap >= 96 * _MiB:                    # v5e / v6e: 128 MiB physical
        return 1024, min(vmem_cap - 16 * _MiB, 100 * _MiB)
    return 512, max(vmem_cap - 12 * _MiB, 32 * _MiB)   # v7x: 64 MiB -> ~52 MiB cap


def _estimate_vmem(S_pad, H_pad, P_pad, tc, L_eff, wbytes):
    weights = (_vmem_array_bytes((H_pad, S_pad), wbytes)          # single-buffered
               + _vmem_array_bytes((H_pad, 1), 4)
               + _vmem_array_bytes((L_eff, H_pad, H_pad), wbytes)
               + _vmem_array_bytes((L_eff, H_pad, 1), 4)
               + _vmem_array_bytes((P_pad, H_pad), wbytes)
               + _vmem_array_bytes((P_pad, 1), 4))
    x_tiles = 2 * _vmem_array_bytes((1, S_pad, tc), wbytes)       # double-buffered
    o_tiles = 2 * _vmem_array_bytes((1, P_pad, tc), 4)
    h_live = 2 * _vmem_array_bytes((H_pad, tc), 4) + _vmem_array_bytes((H_pad, tc), wbytes)
    return weights + x_tiles + o_tiles + h_live + 8 * _MiB        # headroom


def _mlp_kernel(x_ref, w_in_ref, b_in_ref, w_h_ref, b_h_ref,
                w_out_ref, b_out_ref, o_ref, *, num_layers):
    # x block: (1, S_pad, TC) -> (S_pad, TC), bf16
    x = x_ref[0]
    # Input projection (pre-transposed weights): (H, S) @ (S, TC) -> (H, TC) f32 acc.
    h = jnp.dot(w_in_ref[...], x, preferred_element_type=jnp.float32) + b_in_ref[...]
    # Hidden layers, statically unrolled; activations re-cast to bf16 per matmul
    # so the MXU runs at bf16 rate while accumulation stays f32.
    for l in range(num_layers):
        h = jnp.dot(w_h_ref[l], h.astype(w_h_ref.dtype),
                    preferred_element_type=jnp.float32) + b_h_ref[l]
        h = jnp.maximum(h, 0.0)
    # Output projection: (P, H) @ (H, TC) -> (P, TC) == module's (pred_len, channel)
    # layout, so no transpose needed; lane-dense unmasked store.
    out = jnp.dot(w_out_ref[...], h.astype(w_out_ref.dtype),
                  preferred_element_type=jnp.float32) + b_out_ref[...]
    o_ref[0] = out.astype(o_ref.dtype)


def simple_feedforward(x, params, *, num_layers, channel_tile=None,
                       compute_dtype=jnp.bfloat16):
    """x: (B, seq_len, C) float32 -> (B, pred_len, C) float32."""
    w_in, b_in, w_h, b_h, w_out, b_out = params
    B, S, C = x.shape
    H = w_in.shape[1]
    P = w_out.shape[1]

    wbytes = jnp.dtype(compute_dtype).itemsize
    sub = 16 if wbytes == 2 else 8                  # bf16 sublane pack is 16
    S_pad = _round_up(S, sub)
    H_pad = _round_up(H, sub)
    P_pad = _round_up(P, sub)
    L_eff = max(num_layers, 1)                      # guard num_layers == 0

    default_tile, vmem_cap_budget = _default_tile_and_cap()
    target = channel_tile if channel_tile is not None else default_tile

    # Channel tile: pad C UP to the target tile (never collapse to 128 just
    # because the target doesn't divide C).
    tc = min(_round_up(max(target, _LANE), _LANE), _round_up(C, _LANE))
    # v7x megacore: make sure both TensorCores get at least one grid step.
    while tc > _LANE and B * (_round_up(C, tc) // tc) < 2:
        tc -= _LANE
    # Shrink the tile if the resident footprint would exceed the VMEM budget.
    while tc > _LANE and _estimate_vmem(S_pad, H_pad, P_pad, tc, L_eff, wbytes) > vmem_cap_budget:
        tc -= _LANE
    C_pad = _round_up(C, tc)
    vmem_limit = int(min(max(_estimate_vmem(S_pad, H_pad, P_pad, tc, L_eff, wbytes),
                             32 * _MiB), vmem_cap_budget))

    # Zero padding is inert: padded S columns of x meet zero rows of w_in;
    # padded H rows/cols stay zero through bias+ReLU; padded P/C rows/cols of
    # the output are sliced away at the end.
    f32 = jnp.float32
    x_p = jnp.pad(x, ((0, 0), (0, S_pad - S), (0, C_pad - C))).astype(compute_dtype)
    w_in_t = jnp.pad(w_in, ((0, S_pad - S), (0, H_pad - H))).T.astype(compute_dtype)   # (H,S)
    b_in_c = jnp.pad(b_in, ((0, 0), (0, H_pad - H))).reshape(H_pad, 1).astype(f32)     # (H,1)
    if num_layers > 0:
        w_h_t = jnp.pad(w_h, ((0, 0), (0, H_pad - H), (0, H_pad - H))
                        ).transpose(0, 2, 1).astype(compute_dtype)                     # (L,H,H)
        b_h_c = jnp.pad(b_h, ((0, 0), (0, 0), (0, H_pad - H))
                        ).transpose(0, 2, 1).astype(f32)                               # (L,H,1)
    else:
        w_h_t = jnp.zeros((1, H_pad, H_pad), compute_dtype)
        b_h_c = jnp.zeros((1, H_pad, 1), f32)
    w_out_t = jnp.pad(w_out, ((0, H_pad - H), (0, P_pad - P))).T.astype(compute_dtype)  # (P,H)
    b_out_c = jnp.pad(b_out, ((0, 0), (0, P_pad - P))).reshape(P_pad, 1).astype(f32)    # (P,1)

    kernel = functools.partial(_mlp_kernel, num_layers=num_layers)
    grid = (B, C_pad // tc)
    resident = pl.Buffered(1)   # constant-index weights: single VMEM buffer

    out_p = pl.pallas_call(
        kernel,
        out_shape=jax.ShapeDtypeStruct((B, P_pad, C_pad), x.dtype),
        grid=grid,
        in_specs=[
            # Activation tile: double-buffered over the grid.
            pl.BlockSpec((1, S_pad, tc), lambda b, c: (b, 0, c)),
            # Weights & biases: constant index_map -> DMA'd once, VMEM-resident,
            # single-buffered to halve their VMEM footprint.
            pl.BlockSpec((H_pad, S_pad), lambda b, c: (0, 0), pipeline_mode=resident),
            pl.BlockSpec((H_pad, 1), lambda b, c: (0, 0), pipeline_mode=resident),
            pl.BlockSpec((L_eff, H_pad, H_pad), lambda b, c: (0, 0, 0), pipeline_mode=resident),
            pl.BlockSpec((L_eff, H_pad, 1), lambda b, c: (0, 0, 0), pipeline_mode=resident),
            pl.BlockSpec((P_pad, H_pad), lambda b, c: (0, 0), pipeline_mode=resident),
            pl.BlockSpec((P_pad, 1), lambda b, c: (0, 0), pipeline_mode=resident),
        ],
        out_specs=pl.BlockSpec((1, P_pad, tc), lambda b, c: (b, 0, c)),
        compiler_params=pltpu.CompilerParams(
            dimension_semantics=("parallel", "parallel"),
            vmem_limit_bytes=vmem_limit,
        ),
    )(x_p, w_in_t, b_in_c, w_h_t, b_h_c, w_out_t, b_out_c)

    # Kernel already writes the (B, pred_len, channel) layout: just un-pad.
    return out_p[:, :P, :C]


def init_params(key, seq_len, hidden_dim, pred_len, num_layers):
    ks = jax.random.split(key, 6)
    scale = 0.1
    w_in = scale * jax.random.normal(ks[0], (seq_len, hidden_dim), jnp.float32)
    b_in = scale * jax.random.normal(ks[1], (1, hidden_dim), jnp.float32)
    w_h = scale * jax.random.normal(ks[2], (num_layers, hidden_dim, hidden_dim), jnp.float32)
    b_h = scale * jax.random.normal(ks[3], (num_layers, 1, hidden_dim), jnp.float32)
    w_out = scale * jax.random.normal(ks[4], (hidden_dim, pred_len), jnp.float32)
    b_out = scale * jax.random.normal(ks[5], (1, pred_len), jnp.float32)
    return (w_in, b_in, w_h, b_h, w_out, b_out)


def reference(x, params, *, num_layers):
    w_in, b_in, w_h, b_h, w_out, b_out = params
    h = jnp.einsum('bsc,sh->bch', x, w_in) + b_in[0]
    for l in range(num_layers):
        h = jnp.maximum(jnp.einsum('bch,hk->bck', h, w_h[l]) + b_h[l, 0], 0.0)
    o = jnp.einsum('bch,hp->bcp', h, w_out) + b_out[0]
    return jnp.transpose(o, (0, 2, 1))


if __name__ == "__main__":
    B, seq_len, C = 2, 8, 4
    hidden_dim, pred_len, num_layers = 32, 8, 2

    key = jax.random.PRNGKey(0)
    kx, kp = jax.random.split(key)
    x = jax.random.normal(kx, (B, seq_len, C), jnp.float32)
    params = init_params(kp, seq_len, hidden_dim, pred_len, num_layers)

    # bf16 MXU operands (f32 accumulation) -> relaxed tolerance vs the f32 reference.
    fwd = jax.jit(functools.partial(simple_feedforward, num_layers=num_layers))
    out = jax.block_until_ready(fwd(x, params))
    ref = reference(x, params, num_layers=num_layers)
    assert out.shape == (B, pred_len, C), out.shape
    assert jnp.allclose(out, ref, atol=2e-2, rtol=2e-2), float(jnp.max(jnp.abs(out - ref)))

    # Edge case: num_layers = 0 (guarded with a dummy hidden-weight block).
    fwd0 = jax.jit(functools.partial(simple_feedforward, num_layers=0))
    out0 = jax.block_until_ready(fwd0(x, params))
    ref0 = reference(x, params, num_layers=0)
    assert out0.shape == (B, pred_len, C), out0.shape
    assert jnp.allclose(out0, ref0, atol=2e-2, rtol=2e-2), float(jnp.max(jnp.abs(out0 - ref0)))

    print("KERNEL_OK")
</pallas_src>

<mosaic_0001>
module attributes {stable_mosaic.version = 11 : i64} {
  func.func @_mlp_kernel(%arg0: i32, %arg1: i32, %arg2: memref<1x16x128xbf16, #tpu.memory_space<vmem>>, %arg3: memref<32x16xbf16, #tpu.memory_space<vmem>>, %arg4: memref<32x1xf32, #tpu.memory_space<vmem>>, %arg5: memref<2x32x32xbf16, #tpu.memory_space<vmem>>, %arg6: memref<2x32x1xf32, #tpu.memory_space<vmem>>, %arg7: memref<16x32xbf16, #tpu.memory_space<vmem>>, %arg8: memref<16x1xf32, #tpu.memory_space<vmem>>, %arg9: memref<1x16x128xf32, #tpu.memory_space<vmem>>) attributes {dimension_semantics = [#tpu.dimension_semantics<parallel>, #tpu.dimension_semantics<parallel>], iteration_bounds = array<i64: 2, 1>, scalar_prefetch = 0 : i64, scratch_operands = 0 : i64, tpu.core_type = #tpu.core_type<tc>, window_params = [{transform_indices = @transform_0, window_bounds = array<i64: 1, 16, 128>}, {pipeline_mode = #tpu.pipeline_mode<synchronous>, transform_indices = @transform_1, window_bounds = array<i64: 32, 16>}, {pipeline_mode = #tpu.pipeline_mode<synchronous>, transform_indices = @transform_2, window_bounds = array<i64: 32, 1>}, {pipeline_mode = #tpu.pipeline_mode<synchronous>, transform_indices = @transform_3, window_bounds = array<i64: 2, 32, 32>}, {pipeline_mode = #tpu.pipeline_mode<synchronous>, transform_indices = @transform_4, window_bounds = array<i64: 2, 32, 1>}, {pipeline_mode = #tpu.pipeline_mode<synchronous>, transform_indices = @transform_5, window_bounds = array<i64: 16, 32>}, {pipeline_mode = #tpu.pipeline_mode<synchronous>, transform_indices = @transform_6, window_bounds = array<i64: 16, 1>}, {transform_indices = @transform_7, window_bounds = array<i64: 1, 16, 128>}]} {
    %c0 = arith.constant 0 : index
    %c0_0 = arith.constant 0 : index
    %c0_1 = arith.constant 0 : index
    %0 = vector.load %arg2[%c0, %c0_0, %c0_1] : memref<1x16x128xbf16, #tpu.memory_space<vmem>>, vector<1x16x128xbf16>
    %1 = vector.shape_cast %0 : vector<1x16x128xbf16> to vector<16x128xbf16>
    %c0_2 = arith.constant 0 : index
    %c0_3 = arith.constant 0 : index
    %2 = vector.load %arg3[%c0_2, %c0_3] : memref<32x16xbf16, #tpu.memory_space<vmem>>, vector<32x16xbf16>
    %cst = arith.constant dense<0.000000e+00> : vector<32x128xf32>
    %3 = tpu.matmul %2, %1, %cst {dimension_numbers = #tpu.dot_dimension_numbers<[1], [0], [0], [1], [0, 0, 1, 1], [], []>} : vector<32x16xbf16>, vector<16x128xbf16>, vector<32x128xf32> -> vector<32x128xf32>
    %c0_4 = arith.constant 0 : index
    %c0_5 = arith.constant 0 : index
    %4 = vector.load %arg4[%c0_4, %c0_5] : memref<32x1xf32, #tpu.memory_space<vmem>>, vector<32x1xf32>
    %5 = vector.broadcast %4 : vector<32x1xf32> to vector<32x128xf32>
    %6 = arith.addf %3, %5 : vector<32x128xf32>
    %c0_6 = arith.constant 0 : index
    %c0_7 = arith.constant 0 : index
    %c0_8 = arith.constant 0 : index
    %7 = vector.load %arg5[%c0_6, %c0_7, %c0_8] : memref<2x32x32xbf16, #tpu.memory_space<vmem>>, vector<1x32x32xbf16>
    %8 = vector.shape_cast %7 : vector<1x32x32xbf16> to vector<32x32xbf16>
    %9 = arith.truncf %6 : vector<32x128xf32> to vector<32x128xbf16>
    %cst_9 = arith.constant dense<0.000000e+00> : vector<32x128xf32>
    %10 = tpu.matmul %8, %9, %cst_9 {dimension_numbers = #tpu.dot_dimension_numbers<[1], [0], [0], [1], [0, 0, 1, 1], [], []>} : vector<32x32xbf16>, vector<32x128xbf16>, vector<32x128xf32> -> vector<32x128xf32>
    %c0_10 = arith.constant 0 : index
    %c0_11 = arith.constant 0 : index
    %c0_12 = arith.constant 0 : index
    %11 = vector.load %arg6[%c0_10, %c0_11, %c0_12] : memref<2x32x1xf32, #tpu.memory_space<vmem>>, vector<1x32x1xf32>
    %12 = vector.shape_cast %11 : vector<1x32x1xf32> to vector<32x1xf32>
    %13 = vector.broadcast %12 : vector<32x1xf32> to vector<32x128xf32>
    %14 = arith.addf %10, %13 : vector<32x128xf32>
    %cst_13 = arith.constant 0.000000e+00 : f32
    %15 = vector.broadcast %cst_13 : f32 to vector<32x128xf32>
    %16 = arith.maximumf %14, %15 : vector<32x128xf32>
    %c1 = arith.constant 1 : index
    %c0_14 = arith.constant 0 : index
    %c0_15 = arith.constant 0 : index
    %17 = vector.load %arg5[%c1, %c0_14, %c0_15] : memref<2x32x32xbf16, #tpu.memory_space<vmem>>, vector<1x32x32xbf16>
    %18 = vector.shape_cast %17 : vector<1x32x32xbf16> to vector<32x32xbf16>
    %19 = arith.truncf %16 : vector<32x128xf32> to vector<32x128xbf16>
    %cst_16 = arith.constant dense<0.000000e+00> : vector<32x128xf32>
    %20 = tpu.matmul %18, %19, %cst_16 {dimension_numbers = #tpu.dot_dimension_numbers<[1], [0], [0], [1], [0, 0, 1, 1], [], []>} : vector<32x32xbf16>, vector<32x128xbf16>, vector<32x128xf32> -> vector<32x128xf32>
    %c1_17 = arith.constant 1 : index
    %c0_18 = arith.constant 0 : index
    %c0_19 = arith.constant 0 : index
    %21 = vector.load %arg6[%c1_17, %c0_18, %c0_19] : memref<2x32x1xf32, #tpu.memory_space<vmem>>, vector<1x32x1xf32>
    %22 = vector.shape_cast %21 : vector<1x32x1xf32> to vector<32x1xf32>
    %23 = vector.broadcast %22 : vector<32x1xf32> to vector<32x128xf32>
    %24 = arith.addf %20, %23 : vector<32x128xf32>
    %cst_20 = arith.constant 0.000000e+00 : f32
    %25 = vector.broadcast %cst_20 : f32 to vector<32x128xf32>
    %26 = arith.maximumf %24, %25 : vector<32x128xf32>
    %c0_21 = arith.constant 0 : index
    %c0_22 = arith.constant 0 : index
    %27 = vector.load %arg7[%c0_21, %c0_22] : memref<16x32xbf16, #tpu.memory_space<vmem>>, vector<16x32xbf16>
    %28 = arith.truncf %26 : vector<32x128xf32> to vector<32x128xbf16>
    %cst_23 = arith.constant dense<0.000000e+00> : vector<16x128xf32>
    %29 = tpu.matmul %27, %28, %cst_23 {dimension_numbers = #tpu.dot_dimension_numbers<[1], [0], [0], [1], [0, 0, 1, 1], [], []>} : vector<16x32xbf16>, vector<32x128xbf16>, vector<16x128xf32> -> vector<16x128xf32>
    %c0_24 = arith.constant 0 : index
    %c0_25 = arith.constant 0 : index
    %30 = vector.load %arg8[%c0_24, %c0_25] : memref<16x1xf32, #tpu.memory_space<vmem>>, vector<16x1xf32>
    %31 = vector.broadcast %30 : vector<16x1xf32> to vector<16x128xf32>
    %32 = arith.addf %29, %31 : vector<16x128xf32>
    %c0_26 = arith.constant 0 : index
    %c0_27 = arith.constant 0 : index
    %c0_28 = arith.constant 0 : index
    %33 = vector.load %arg9[%c0_26, %c0_27, %c0_28] : memref<1x16x128xf32, #tpu.memory_space<vmem>>, vector<1x16x128xf32>
    %34 = vector.shape_cast %33 : vector<1x16x128xf32> to vector<16x128xf32>
    %35 = vector.shape_cast %32 : vector<16x128xf32> to vector<1x16x128xf32>
    tpu.vector_store %arg9[%c0_26, %c0_27, %c0_28], %35 {strides = array<i32>} : memref<1x16x128xf32, #tpu.memory_space<vmem>>, vector<1x16x128xf32>,
    return
  }
  func.func @transform_0(%arg0: i32, %arg1: i32) -> (i32, i32, i32) {
    %c0_i32 = arith.constant 0 : i32
    %c0_i32_0 = arith.constant 0 : i32
    return %arg0, %c0_i32, %arg1 : i32, i32, i32
  }
  func.func @transform_1(%arg0: i32, %arg1: i32) -> (i32, i32) {
    %c0_i32 = arith.constant 0 : i32
    %c0_i32_0 = arith.constant 0 : i32
    %c0_i32_1 = arith.constant 0 : i32
    return %c0_i32, %c0_i32_0 : i32, i32
  }
  func.func @transform_2(%arg0: i32, %arg1: i32) -> (i32, i32) {
    %c0_i32 = arith.constant 0 : i32
    %c0_i32_0 = arith.constant 0 : i32
    %c0_i32_1 = arith.constant 0 : i32
    return %c0_i32, %c0_i32_0 : i32, i32
  }
  func.func @transform_3(%arg0: i32, %arg1: i32) -> (i32, i32, i32) {
    %c0_i32 = arith.constant 0 : i32
    %c0_i32_0 = arith.constant 0 : i32
    %c0_i32_1 = arith.constant 0 : i32
    %c0_i32_2 = arith.constant 0 : i32
    return %c0_i32, %c0_i32_0, %c0_i32_1 : i32, i32, i32
  }
  func.func @transform_4(%arg0: i32, %arg1: i32) -> (i32, i32, i32) {
    %c0_i32 = arith.constant 0 : i32
    %c0_i32_0 = arith.constant 0 : i32
    %c0_i32_1 = arith.constant 0 : i32
    %c0_i32_2 = arith.constant 0 : i32
    return %c0_i32, %c0_i32_0, %c0_i32_1 : i32, i32, i32
  }
  func.func @transform_5(%arg0: i32, %arg1: i32) -> (i32, i32) {
    %c0_i32 = arith.constant 0 : i32
    %c0_i32_0 = arith.constant 0 : i32
    %c0_i32_1 = arith.constant 0 : i32
    return %c0_i32, %c0_i32_0 : i32, i32
  }
  func.func @transform_6(%arg0: i32, %arg1: i32) -> (i32, i32) {
    %c0_i32 = arith.constant 0 : i32
    %c0_i32_0 = arith.constant 0 : i32
    %c0_i32_1 = arith.constant 0 : i32
    return %c0_i32, %c0_i32_0 : i32, i32
  }
  func.func @transform_7(%arg0: i32, %arg1: i32) -> (i32, i32, i32) {
    %c0_i32 = arith.constant 0 : i32
    %c0_i32_0 = arith.constant 0 : i32
    return %arg0, %c0_i32, %arg1 : i32, i32, i32
  }
}

</mosaic_0001>

<bundles_post_ra>
// kernel: simple_feedforward.1
= control target key start
LH: loop header
LB: loop body
LE: loop exit
PB: predicated region body
PF: predicated region fallthrough
CT: control target
= control target key end

     0   :  { %s948_s24 = smov 0   ;;  %s950_s25 = smov 0   ;;  %s1055_s0 = inlined_call_operand.vmem [shape: bf16[2,16,128], index: 0, kind: input, shape index: {}]   ;;  %s1056_s1 = inlined_call_operand.vmem [shape: bf16[32,16], index: 1, kind: input, shape index: {}]   ;;  %s1057_s2 = inlined_call_operand.vmem [shape: f32[32,1], index: 2, kind: input, shape index: {}]   ;;  %s1058_s3 = inlined_call_operand.vmem [shape: bf16[2,32,32], index: 3, kind: input, shape index: {}]   ;;  %s1059_s4 = inlined_call_operand.vmem [shape: f32[2,32,1], index: 4, kind: input, shape index: {}]   ;;  %s1060_s5 = inlined_call_operand.vmem [shape: bf16[16,32], index: 5, kind: input, shape index: {}]   ;;  %s1061_s6 = inlined_call_operand.vmem [shape: f32[16,1], index: 6, kind: input, shape index: {}]   ;;  %s1062_s7 = inlined_call_operand.vmem [shape: f32[2,16,128], index: 7, kind: output, shape index: {}]  }
   0x1   :  { %s952_s26 = smov 0  }
   0x2 LB: > { %s29_s27 = sadd.s32 1, %s899_s25  ;;  %p768_p0 = scmp.ge.s32.totalorder %s903_s26, 1  ;;  %s903_s26 = sphi %s952_s26, %s17_s26   ;;  %s899_s25 = sphi %s950_s25, %s1064_s25   ;;  %s895_s24 = sphi %s948_s24, %s1063_s24  }
   0x3   : > { %p31_p1 = scmp.ge.s32.totalorder %s29_s27, 2  ;;  %p256_p2 = scmp.lt.s32.totalorder %s903_s26, 3 }
   0x5   : > { %s1066_s27 = smov (%p31_p1, %s29_s27), 0  ;;  %p257_p3 = pnand %p768_p0, %p256_p2 }
   0x6   : > { %p294_p4 = scmp.lt.s32.totalorder (!%p257_p3), %s895_s24, 1  ;;  %v874_v0 = vld [vmem:[%s1056_s1] sm:$0xff] (!%p257_p3)   ;;  %vm357_vm0 = vcmask (!%p257_p3), 130048   ;;  %v319_v2 = vld [vmem:[%s1057_s2 + $0x10] sm:$0xff] (!%p257_p3)  ;;  %v905_v3 = vmov (!%p257_p3), 0   ;;  %v318_v4 = vld [vmem:[%s1057_s2 + $0x8] sm:$0xff] (!%p257_p3) }
   0x7   : > { %260 = sbr.rel (%p257_p3) target bundleno = 923 (0x39b), region = 48  ;;  %816 = vmatprep.mubr.msk.bf16.mxu0 (!%p257_p3), %vm357_vm0, %v874_v0  ;;  %v317_v1 = vld [vmem:[%s1057_s2] sm:$0xff] (!%p257_p3)  ;;  %871 = vset.pattern.permute.xlu0 (!%p257_p3), %v905_v3  ;;  %v320_v5 = vld [vmem:[%s1057_s2 + $0x18] sm:$0xff] (!%p257_p3)  ;;  %v875_v7 = vld [vmem:[%s1056_s1 + $0x8] sm:$0xff] (!%p257_p3)   ;;  %vm453_vm1 = vcmask (!%p257_p3), 261120   ;;  %v906_v54 = vmov (!%p257_p3), 0.0  }
   0x8   : > { %872 = vset.pattern.permute.xlu1 (!%p257_p3), %v905_v3  ;;  %323 = vperm.xlu0 (!%p257_p3), %871, %v317_v1   ;;  %v419_v8 = vld [vmem:[%s1059_s4] sm:$0xff] (!%p257_p3)  ;;  %v420_v9 = vld [vmem:[%s1059_s4 + $0x8] sm:$0xff] (!%p257_p3)  ;;  %v421_v10 = vld [vmem:[%s1059_s4 + $0x10] sm:$0xff] (!%p257_p3)  ;;  %vm907_vm2 = vmmov (!%p257_p3), 0  }
   0x9   : > { %333 = vperm.xlu1 (!%p257_p3), %872, %v319_v2   ;;  %v422_v11 = vld [vmem:[%s1059_s4 + $0x18] sm:$0xff] (!%p257_p3)  ;;  %v786_v12 = vld [vmem:[%s1059_s4 + $0x20] sm:$0xff] (!%p257_p3)  ;;  %v787_v13 = vld [vmem:[%s1059_s4 + $0x28] sm:$0xff] (!%p257_p3) }
   0xa   : > { %v788_v14 = vld [vmem:[%s1059_s4 + $0x30] sm:$0xff] (!%p257_p3)  ;;  %v789_v15 = vld [vmem:[%s1059_s4 + $0x38] sm:$0xff] (!%p257_p3)  ;;  %v618_v16 = vld [vmem:[%s1061_s6] sm:$0xff] (!%p257_p3) }
   0xb   : > { %v619_v17 = vld [vmem:[%s1061_s6 + $0x8] sm:$0xff] (!%p257_p3)  ;;  %v876_v18 = vld [vmem:[%s1058_s3] sm:$0xff] (!%p257_p3)   ;;  %v878_v34 = vld [vmem:[%s1058_s3 + $0x10] sm:$0xff] (!%p257_p3)  }
   0xc   : > { %328 = vperm.xlu0 (!%p257_p3), %871, %v318_v4   ;;  %824 = vmatprep.mubr.msk.bf16.mxu1 (!%p257_p3), %vm453_vm1, %v876_v18  ;;  %v877_v33 = vld [vmem:[%s1058_s3 + $0x8] sm:$0xff] (!%p257_p3)   ;;  %v879_v53 = vld [vmem:[%s1058_s3 + $0x18] sm:$0xff] (!%p257_p3)  }
   0xd   : > { %338 = vperm.xlu1 (!%p257_p3), %872, %v320_v5  }
   0xe   : > { %s1068_s24 = smov (!%p294_p4, %s895_s24), 1 }
   0xf   : > { %s798_s11 = sshll.u32 %s1068_s24, 3  ;;  %s799_s13 = sshll.u32 %s1068_s24, 4 }
  0x10   : > { %s301_s14 = scalar_lea.vmem %s1055_s0, %s798_s11  ;;  %425 = vperm.xlu0 %871, %v419_v8   ;;  %s309_s16 = scalar_lea.vmem %s1062_s7, %s799_s13 }
  0x11   : > { %v873_v6 = vld [vmem:[%s301_s14] sm:$0xff]   ;;  %430 = vperm.xlu1 %872, %v420_v9  }
  0x12   : > { %814 = vmatprep.subr.bf16.mxu0 %v873_v6  ;;  %v880_v9 = vld [vmem:[%s1060_s5] sm:$0xff]  }
  0x13   : > { %815 = vmatpush3.bf16.msra.mxu0 %v873_v6 }
  0x14   : > { %435 = vperm.xlu0 %871, %v421_v10  }
  0x15   : > { %440 = vperm.xlu1 %872, %v422_v11  }
  0x16   : > { %817 = vmatmul.mubr.msk.bf16.vlgmr.msra.gmra.mrb[0].mxu0 %vm357_vm0, %v875_v7 }
  0x17   : > { %832 = vmatprep.mubr.msk.bf16.mxu0 %vm453_vm1, %v878_v34 }
  0x18   : > { %527 = vperm.xlu0 %871, %v786_v12  }
  0x19   : > { %532 = vperm.xlu1 %872, %v787_v13  }
  0x1c   : > { %537 = vperm.xlu0 %871, %v788_v14  }
  0x1d   : > { %542 = vperm.xlu1 %872, %v789_v15  }
  0x20   : > { %622 = vperm.xlu0 %871, %v618_v16  }
  0x21   : > { %627 = vperm.xlu1 %872, %v619_v17  }
  0x87   : > { %v324_v20 = vpop.permute.xlu0 %323 }
  0x88   : > { %v334_v19 = vpop.permute.xlu1 %333 }
  0x8b   : > { %v329_v25 = vpop.permute.xlu0 %328 }
  0x8c   : > { %v339_v23 = vpop.permute.xlu1 %338 }
  0x8f   : > { %v426_v35 = vpop.permute.xlu0 %425 }
  0x90   : > { %v431_v36 = vpop.permute.xlu1 %430 }
  0x93   : > { %v436_v37 = vpop.permute.xlu0 %435 }
  0x94   : > { %v441_v41 = vpop.permute.xlu1 %440 }
  0x97   : > { %v528_v55 = vpop.permute.xlu0 %527 }
  0x98   : > { %v533_v56 = vpop.permute.xlu1 %532 }
  0x9b   : > { %v538_v57 = vpop.permute.xlu0 %537 }
  0x9c   : > { %v543_v61 = vpop.permute.xlu1 %542 }
  0x9f   : > { %v623_v10 = vpop.permute.xlu0 %622 }
  0xa0   : > { %v628_v14 = vpop.permute.xlu1 %627 }
  0xe9   : > { %v818_v21 = vpop.f32.mrb[0].mxu0 }
  0xea   : > { %v398_v22 = vpop.f32.mrb[1].mxu0  ;;  %v407_v26 = vadd.f32 %v818_v21, %v334_v19 }
  0xeb   : > { %v819_v24 = vpop.f32.mrb[2].mxu0  ;;  %v399_v29 = vadd.f32 %v398_v22, %v324_v20 }
  0xec   : > { %v410_v27 = vadd.f32 %v819_v24, %v339_v23  ;;  %v401_v28 = vpop.f32.mrb[3].mxu0 }
  0xed   : > { %v402_v30 = vadd.f32 %v401_v28, %v329_v25 }
  0xee   : > { %v418_v31 = vpack.c.bf16 %v410_v27, %v407_v26 }
  0xef   : > { %v417_v32 = vpack.c.bf16 %v402_v30, %v399_v29 }
  0xf1   : > { %820 = vmatprep.subr.bf16.mxu1 %v417_v32 }
  0xf2   : > { %821 = vmatpush3.bf16.msra.mxu1 %v417_v32 }
  0xf3   : > { %822 = vmatprep.subr.bf16.mxu1 %v418_v31 }
  0xf6   : > { %823 = vmatpush3.bf16.msra.mxu1 %v418_v31 }
  0xf7   : > { %836 = vmatprep.subr.bf16.mxu1 %v906_v54 }
  0xf9   : > { %825 = vmatmul.mubr.msk.bf16.vlgmr.msra.gmra.mrb[0].mxu1 %vm453_vm1, %v877_v33 }
  0xfa   : > { %840 = vmatprep.mubr.msk.bf16.mxu1 %vm907_vm2, %v906_v54 }
 0x1cc   : > { %v826_v38 = vpop.f32.mrb[0].mxu1 }
 0x1cd   : > { %v503_v39 = vadd.f32 %v826_v38, %v436_v37  ;;  %v494_v40 = vpop.f32.mrb[1].mxu1 }
 0x1ce   : > { %v495_v42 = vadd.f32 %v494_v40, %v426_v35  ;;  %v827_v43 = vpop.f32.mrb[2].mxu1 }
 0x1cf   : > { %v506_v44 = vadd.f32 %v827_v43, %v441_v41  ;;  %v497_v45 = vpop.f32.mrb[3].mxu1  ;;  %v511_v47 = vmax.f32 %v503_v39, 0.0 }
 0x1d0   : > { %v498_v46 = vadd.f32 %v497_v45, %v431_v36  ;;  %v509_v49 = vmax.f32 %v495_v42, 0.0 }
 0x1d1   : > { %v512_v48 = vmax.f32 %v506_v44, 0.0 }
 0x1d2   : > { %v510_v50 = vmax.f32 %v498_v46, 0.0 }
 0x1d3   : > { %v519_v51 = vpack.c.bf16 %v512_v48, %v511_v47 }
 0x1d4   : > { %v518_v52 = vpack.c.bf16 %v510_v50, %v509_v49 }
 0x1d6   : > { %828 = vmatprep.subr.bf16.mxu0 %v518_v52 }
 0x1d7   : > { %829 = vmatpush3.bf16.msra.mxu0 %v518_v52 }
 0x1d8   : > { %830 = vmatprep.subr.bf16.mxu0 %v519_v51 }
 0x1db   : > { %831 = vmatpush3.bf16.msra.mxu0 %v519_v51 }
 0x1de   : > { %833 = vmatmul.mubr.msk.bf16.vlgmr.msra.gmra.mrb[4].mxu0 %vm453_vm1, %v879_v53 }
 0x2b1   : > { %v834_v58 = vpop.f32.mrb[4].mxu0 }
 0x2b2   : > { %v604_v59 = vadd.f32 %v834_v58, %v538_v57  ;;  %v595_v60 = vpop.f32.mrb[5].mxu0 }
 0x2b3   : > { %v596_v62 = vadd.f32 %v595_v60, %v528_v55  ;;  %v835_v63 = vpop.f32.mrb[6].mxu0 }
 0x2b4   : > { %v607_v0 = vadd.f32 %v835_v63, %v543_v61  ;;  %v598_v1 = vpop.f32.mrb[7].mxu0  ;;  %v612_v3 = vmax.f32 %v604_v59, 0.0 }
 0x2b5   : > { %v599_v2 = vadd.f32 %v598_v1, %v533_v56  ;;  %v610_v5 = vmax.f32 %v596_v62, 0.0 }
 0x2b6   : > { %v613_v4 = vmax.f32 %v607_v0, 0.0 }
 0x2b7   : > { %v611_v6 = vmax.f32 %v599_v2, 0.0 }
 0x2b8   : > { %v617_v7 = vpack.c.bf16 %v613_v4, %v612_v3 }
 0x2b9   : > { %v616_v8 = vpack.c.bf16 %v611_v6, %v610_v5 }
 0x2bb   : > { %837 = vmatpush3.bf16.msra.mxu1 %v616_v8 }
 0x2bc   : > { %838 = vmatprep.subr.bf16.mxu1 %v906_v54 }
 0x2bf   : > { %839 = vmatpush3.bf16.msra.mxu1 %v617_v7 }
 0x2c2   : > { %841 = vmatmul.mubr.msk.bf16.vlgmr.msra.gmra.mrb[4].mxu1 %vm453_vm1, %v880_v9 }
 0x395   : > { %v672_v11 = vpop.f32.mrb[4].mxu1 }
 0x396   : > { %v673_v12 = vadd.f32 %v672_v11, %v623_v10  ;;  %v842_v13 = vpop.f32.mrb[5].mxu1 }
 0x397   : > { %v675_v15 = vpop.f32.mrb[6].mxu1 }
 0x398   : > { %679 = vst [vmem:[%s309_s16] sm:$0xff] %v673_v12  ;;  %v676_v16 = vadd.f32 %v675_v15, %v628_v14  ;;  %v843_v17 = vpop.f32.mrb[7].mxu1 }
 0x39a   : > { %680 = vst [vmem:[%s309_s16 + $0x8] sm:$0xff] %v676_v16 }
 0x39b PF: > { %s17_s26 = sadd.s32 1, %s903_s26   ;;  %s1063_s24 = smov %s899_s25 }
 0x39c   : > { %p14_p5 = scmp.ge.s32.totalorder %s17_s26, 4   ;;  %s1064_s25 = smov %s1066_s27 }
 0x39e   :  { %16 = sbr.rel (!%p14_p5) target bundleno = 2 (0x2), region = 80 }

</bundles_post_ra>
